<compile_context>
chip_gen: v5e
topology: v5e:2x2
jax: 0.10.0
libtpu: 0.0.40
codegen_flags: <defaults>
</compile_context>

<pallas_src>
import jax
import jax.numpy as jnp
from jax.experimental import pallas as pl
from jax.experimental.pallas import tpu as pltpu


def _disc_kernel(x_ref, w0_ref, b0_ref, w1_ref, b1_ref, w2_ref, b2_ref, o_ref):
    # In-kernel bf16 cast of the streamed f32 x tile: free VALU work under MXU
    # slack, and x is read from HBM exactly once (4 B/elem instead of ~8).
    x = x_ref[...].astype(jnp.bfloat16)                      # (TILE_N, E)

    # Layer 0: Linear(E -> H) on the MXU (bf16 in, f32 accumulate) + LeakyReLU(0.2).
    h = jnp.dot(x, w0_ref[...], preferred_element_type=jnp.float32) + b0_ref[...]
    h = jnp.maximum(h, 0.2 * h)                              # LeakyReLU, slope < 1

    # Layer 1: Linear(H -> H) + LeakyReLU(0.2).
    h = jnp.dot(h.astype(jnp.bfloat16), w1_ref[...],
                preferred_element_type=jnp.float32) + b1_ref[...]
    h = jnp.maximum(h, 0.2 * h)

    # Layer 2: Linear(H -> 1) as VPU multiply + lane reduction, then Sigmoid.
    # NOTE: when the last batch block is partial, its padded rows hold garbage;
    # rows are independent (the contraction is over H, which is never padded),
    # so garbage never mixes into valid rows and the output write is clipped.
    z = jnp.sum(h * w2_ref[...], axis=-1, keepdims=True) + b2_ref[0, 0]
    o_ref[...] = jax.nn.sigmoid(z).astype(o_ref.dtype)


def _vmem_capacity_bytes():
    """Per-core VMEM capacity; conservative (v7x) fallback if query fails."""
    try:
        info = pltpu.get_tpu_info()
        cap = getattr(info, "vmem_capacity_bytes", None)
        if cap:
            return int(cap)
    except Exception:
        pass
    return 64 * 1024 * 1024


def _round_up(x, m):
    return ((x + m - 1) // m) * m


def _pick_tile_n(N, E, H, vmem_cap):
    """Largest 128-multiple batch tile that fits the VMEM budget, capped so that
    there are >= 2 grid steps (v7x megacore) whenever the batch allows it."""
    if N <= 128:
        # Block equals the full array dims -> always a legal block shape.
        return N
    # Per-row VMEM bytes: x bf16 (double-buffered) + h f32 + h bf16 recast + out f32 (x2).
    per_row = 2 * 2 * E + 4 * H + 2 * H + 2 * 4
    # Resident weights (bf16 W0/W1 + f32 biases/row), x2 for pipeline double-buffering.
    weight_bytes = 2 * (2 * (E * H + H * H) + 4 * (3 * H + 2))
    budget = int(vmem_cap * 0.70) - weight_bytes
    tile = budget // per_row if budget > 0 else 128
    tile = min(tile, 1024)                               # amortization plateaus
    tile = min(tile, _round_up(pl.cdiv(N, 2), 128))      # keep >= 2 grid steps
    tile = max(128, (tile // 128) * 128)
    return tile


def discriminator_forward(x, params, *, tile_n=None):
    """x: (N, E) float32.  Returns (N,) float32 in [0, 1]."""
    w0, b0, w1, b1, w2, b2 = params
    N, E = x.shape
    H = w0.shape[1]
    assert x.ndim == 2 and E == w0.shape[0]

    vmem_cap = _vmem_capacity_bytes()
    if tile_n is None:
        tile_n = _pick_tile_n(N, E, H, vmem_cap)
    tile_n = min(tile_n, N)
    if tile_n != N:
        tile_n = max(8, (tile_n // 8) * 8)        # (8,128) sublane constraint
    grid = (pl.cdiv(N, tile_n),)

    # ~48 MiB on 64-MiB parts (v7x), ~96 MiB on 128-MiB parts (v5e/v6e).
    vmem_limit = max(32 * 1024 * 1024, min(int(vmem_cap * 0.75), 100 * 1024 * 1024))

    # bf16 weights for the MXU layers; small layer-2 row + biases stay f32.
    w0b = w0.astype(jnp.bfloat16)
    w1b = w1.astype(jnp.bfloat16)
    w2_row = w2.reshape(1, H).astype(jnp.float32)             # (1, H)
    b2s = b2.reshape(1, 1).astype(jnp.float32)                # SMEM scalar

    cost = pl.CostEstimate(
        flops=2 * N * H * (E + H) + 2 * N * H,
        transcendentals=N,
        bytes_accessed=N * E * 4 + 2 * (E * H + H * H) + 4 * (3 * H + 1) + N * 4,
    )

    out = pl.pallas_call(
        _disc_kernel,
        out_shape=jax.ShapeDtypeStruct((N, 1), jnp.float32),
        grid=grid,
        in_specs=[
            pl.BlockSpec((tile_n, E), lambda i: (i, 0)),      # x tile (streamed, f32)
            pl.BlockSpec((E, H), lambda i: (0, 0)),           # W0 (VMEM-resident)
            pl.BlockSpec((1, H), lambda i: (0, 0)),           # b0
            pl.BlockSpec((H, H), lambda i: (0, 0)),           # W1 (VMEM-resident)
            pl.BlockSpec((1, H), lambda i: (0, 0)),           # b1
            pl.BlockSpec((1, H), lambda i: (0, 0)),           # w2 as a row
            pl.BlockSpec(memory_space=pltpu.MemorySpace.SMEM),  # b2 scalar
        ],
        out_specs=pl.BlockSpec((tile_n, 1), lambda i: (i, 0)),
        compiler_params=pltpu.CompilerParams(
            # Batch tiles are independent -> megacore-shardable on v7x.
            dimension_semantics=("parallel",),
            vmem_limit_bytes=vmem_limit,
        ),
        cost_estimate=cost,
    )(x, w0b, b0, w1b, b1, w2_row, b2s)
    return out.reshape(-1)


def init_params(key, emb_dim, hid_dim):
    """Deterministic PyTorch-Linear-style init: U(-1/sqrt(in), 1/sqrt(in))."""
    ks = jax.random.split(key, 6)

    def linear(kw, kb, d_in, d_out):
        bound = 1.0 / jnp.sqrt(jnp.float32(d_in))
        w = jax.random.uniform(kw, (d_in, d_out), jnp.float32, -bound, bound)
        b = jax.random.uniform(kb, (1, d_out), jnp.float32, -bound, bound)
        return w, b

    w0, b0 = linear(ks[0], ks[1], emb_dim, hid_dim)
    w1, b1 = linear(ks[2], ks[3], hid_dim, hid_dim)
    w2, b2 = linear(ks[4], ks[5], hid_dim, 1)
    return (w0, b0, w1, b1, w2, b2)


def _reference_forward(x, params):
    """Pure-JAX reference mirroring the kernel's bf16-input / f32-accum numerics."""
    w0, b0, w1, b1, w2, b2 = params
    h = jnp.dot(x.astype(jnp.bfloat16), w0.astype(jnp.bfloat16),
                preferred_element_type=jnp.float32) + b0
    h = jnp.maximum(h, 0.2 * h)
    h = jnp.dot(h.astype(jnp.bfloat16), w1.astype(jnp.bfloat16),
                preferred_element_type=jnp.float32) + b1
    h = jnp.maximum(h, 0.2 * h)
    z = jnp.sum(h * w2.reshape(1, -1), axis=-1, keepdims=True) + b2[0, 0]
    return jax.nn.sigmoid(z).reshape(-1)


if __name__ == "__main__":
    # Small shapes: batch=256, bert_hidden_size=64, dis_layers=2, dis_hid_dim=64.
    # Auto tile sizing picks tile_n=128 -> grid=(2,), exercising the batch
    # pipelining / multi-step path.
    N, E, H = 256, 64, 64
    key = jax.random.PRNGKey(0)
    k_x, k_p = jax.random.split(key)

    x = jax.random.normal(k_x, (N, E), dtype=jnp.float32)
    params = init_params(k_p, E, H)

    out = discriminator_forward(x, params)
    out = jax.block_until_ready(out)

    ref = _reference_forward(x, params)
    assert out.shape == (N,), out.shape
    assert jnp.allclose(out, ref, atol=1e-4, rtol=1e-4), (out, ref)

    print("KERNEL_OK")
</pallas_src>

<mosaic_0001>
module attributes {stable_mosaic.version = 11 : i64} {
  func.func @_disc_kernel(%arg0: i32, %arg1: memref<128x64xf32, #tpu.memory_space<vmem>>, %arg2: memref<64x64xbf16, #tpu.memory_space<vmem>>, %arg3: memref<1x64xf32, #tpu.memory_space<vmem>>, %arg4: memref<64x64xbf16, #tpu.memory_space<vmem>>, %arg5: memref<1x64xf32, #tpu.memory_space<vmem>>, %arg6: memref<1x64xf32, #tpu.memory_space<vmem>>, %arg7: memref<1x1xf32, #tpu.memory_space<smem>>, %arg8: memref<128x1xf32, #tpu.memory_space<vmem>>) attributes {dimension_semantics = [#tpu.dimension_semantics<parallel>], iteration_bounds = array<i64: 2>, scalar_prefetch = 0 : i64, scratch_operands = 0 : i64, tpu.core_type = #tpu.core_type<tc>, window_params = [{transform_indices = @transform_0, window_bounds = array<i64: 128, 64>}, {pipeline_mode = #tpu.pipeline_mode<synchronous>, transform_indices = @transform_1, window_bounds = array<i64: 64, 64>}, {pipeline_mode = #tpu.pipeline_mode<synchronous>, transform_indices = @transform_2, window_bounds = array<i64: 1, 64>}, {pipeline_mode = #tpu.pipeline_mode<synchronous>, transform_indices = @transform_3, window_bounds = array<i64: 64, 64>}, {pipeline_mode = #tpu.pipeline_mode<synchronous>, transform_indices = @transform_4, window_bounds = array<i64: 1, 64>}, {pipeline_mode = #tpu.pipeline_mode<synchronous>, transform_indices = @transform_5, window_bounds = array<i64: 1, 64>}, {transform_indices = @transform_6, window_bounds = array<i64: 1, 1>}, {transform_indices = @transform_7, window_bounds = array<i64: 128, 1>}]} {
    %c0 = arith.constant 0 : index
    %c0_0 = arith.constant 0 : index
    %0 = vector.load %arg1[%c0, %c0_0] : memref<128x64xf32, #tpu.memory_space<vmem>>, vector<128x64xf32>
    %1 = arith.truncf %0 : vector<128x64xf32> to vector<128x64xbf16>
    %c0_1 = arith.constant 0 : index
    %c0_2 = arith.constant 0 : index
    %2 = vector.load %arg2[%c0_1, %c0_2] : memref<64x64xbf16, #tpu.memory_space<vmem>>, vector<64x64xbf16>
    %cst = arith.constant dense<0.000000e+00> : vector<128x64xf32>
    %3 = tpu.matmul %1, %2, %cst {dimension_numbers = #tpu.dot_dimension_numbers<[1], [0], [0], [1], [0, 0, 1, 1], [], []>} : vector<128x64xbf16>, vector<64x64xbf16>, vector<128x64xf32> -> vector<128x64xf32>
    %c0_3 = arith.constant 0 : index
    %c0_4 = arith.constant 0 : index
    %4 = vector.load %arg3[%c0_3, %c0_4] : memref<1x64xf32, #tpu.memory_space<vmem>>, vector<1x64xf32>
    %5 = vector.broadcast %4 : vector<1x64xf32> to vector<128x64xf32>
    %6 = arith.addf %3, %5 : vector<128x64xf32>
    %cst_5 = arith.constant 2.000000e-01 : f32
    %7 = vector.broadcast %cst_5 : f32 to vector<128x64xf32>
    %8 = arith.mulf %7, %6 : vector<128x64xf32>
    %9 = arith.maximumf %6, %8 : vector<128x64xf32>
    %10 = arith.truncf %9 : vector<128x64xf32> to vector<128x64xbf16>
    %c0_6 = arith.constant 0 : index
    %c0_7 = arith.constant 0 : index
    %11 = vector.load %arg4[%c0_6, %c0_7] : memref<64x64xbf16, #tpu.memory_space<vmem>>, vector<64x64xbf16>
    %cst_8 = arith.constant dense<0.000000e+00> : vector<128x64xf32>
    %12 = tpu.matmul %10, %11, %cst_8 {dimension_numbers = #tpu.dot_dimension_numbers<[1], [0], [0], [1], [0, 0, 1, 1], [], []>} : vector<128x64xbf16>, vector<64x64xbf16>, vector<128x64xf32> -> vector<128x64xf32>
    %c0_9 = arith.constant 0 : index
    %c0_10 = arith.constant 0 : index
    %13 = vector.load %arg5[%c0_9, %c0_10] : memref<1x64xf32, #tpu.memory_space<vmem>>, vector<1x64xf32>
    %14 = vector.broadcast %13 : vector<1x64xf32> to vector<128x64xf32>
    %15 = arith.addf %12, %14 : vector<128x64xf32>
    %cst_11 = arith.constant 2.000000e-01 : f32
    %16 = vector.broadcast %cst_11 : f32 to vector<128x64xf32>
    %17 = arith.mulf %16, %15 : vector<128x64xf32>
    %18 = arith.maximumf %15, %17 : vector<128x64xf32>
    %c0_12 = arith.constant 0 : index
    %c0_13 = arith.constant 0 : index
    %19 = vector.load %arg6[%c0_12, %c0_13] : memref<1x64xf32, #tpu.memory_space<vmem>>, vector<1x64xf32>
    %20 = vector.broadcast %19 : vector<1x64xf32> to vector<128x64xf32>
    %21 = arith.mulf %18, %20 : vector<128x64xf32>
    %cst_14 = arith.constant dense<0.000000e+00> : vector<128xf32>
    %22 = vector.multi_reduction <add>, %21, %cst_14 [1] : vector<128x64xf32> to vector<128xf32>
    %23 = vector.shape_cast %22 : vector<128xf32> to vector<128x1xf32>
    %c0_15 = arith.constant 0 : index
    %c0_16 = arith.constant 0 : index
    %24 = memref.load %arg7[%c0_15, %c0_16] : memref<1x1xf32, #tpu.memory_space<smem>>
    %25 = vector.broadcast %24 : f32 to vector<128x1xf32>
    %26 = arith.addf %23, %25 : vector<128x1xf32>
    %27 = arith.negf %26 : vector<128x1xf32>
    %28 = math.exp %27 : vector<128x1xf32>
    %cst_17 = arith.constant 1.000000e+00 : f32
    %29 = vector.broadcast %cst_17 : f32 to vector<128x1xf32>
    %30 = arith.addf %29, %28 : vector<128x1xf32>
    %31 = arith.divf %29, %30 : vector<128x1xf32>
    %c0_18 = arith.constant 0 : index
    %c0_19 = arith.constant 0 : index
    %32 = vector.load %arg8[%c0_18, %c0_19] : memref<128x1xf32, #tpu.memory_space<vmem>>, vector<128x1xf32>
    tpu.vector_store %arg8[%c0_18, %c0_19], %31 {strides = array<i32>} : memref<128x1xf32, #tpu.memory_space<vmem>>, vector<128x1xf32>,
    return
  }
  func.func @transform_0(%arg0: i32) -> (i32, i32) {
    %c0_i32 = arith.constant 0 : i32
    %c0_i32_0 = arith.constant 0 : i32
    return %arg0, %c0_i32 : i32, i32
  }
  func.func @transform_1(%arg0: i32) -> (i32, i32) {
    %c0_i32 = arith.constant 0 : i32
    %c0_i32_0 = arith.constant 0 : i32
    %c0_i32_1 = arith.constant 0 : i32
    return %c0_i32, %c0_i32_0 : i32, i32
  }
  func.func @transform_2(%arg0: i32) -> (i32, i32) {
    %c0_i32 = arith.constant 0 : i32
    %c0_i32_0 = arith.constant 0 : i32
    %c0_i32_1 = arith.constant 0 : i32
    return %c0_i32, %c0_i32_0 : i32, i32
  }
  func.func @transform_3(%arg0: i32) -> (i32, i32) {
    %c0_i32 = arith.constant 0 : i32
    %c0_i32_0 = arith.constant 0 : i32
    %c0_i32_1 = arith.constant 0 : i32
    return %c0_i32, %c0_i32_0 : i32, i32
  }
  func.func @transform_4(%arg0: i32) -> (i32, i32) {
    %c0_i32 = arith.constant 0 : i32
    %c0_i32_0 = arith.constant 0 : i32
    %c0_i32_1 = arith.constant 0 : i32
    return %c0_i32, %c0_i32_0 : i32, i32
  }
  func.func @transform_5(%arg0: i32) -> (i32, i32) {
    %c0_i32 = arith.constant 0 : i32
    %c0_i32_0 = arith.constant 0 : i32
    %c0_i32_1 = arith.constant 0 : i32
    return %c0_i32, %c0_i32_0 : i32, i32
  }
  func.func @transform_6(%arg0: i32) -> (i32, i32) {
    %c0_i32 = arith.constant 0 : i32
    %c0_i32_0 = arith.constant 0 : i32
    %c0_i32_1 = arith.constant 0 : i32
    return %c0_i32, %c0_i32_0 : i32, i32
  }
  func.func @transform_7(%arg0: i32) -> (i32, i32) {
    %c0_i32 = arith.constant 0 : i32
    %c0_i32_0 = arith.constant 0 : i32
    return %arg0, %c0_i32 : i32, i32
  }
}

</mosaic_0001>

<bundles_post_ra>
// kernel: tpu_custom_call.1
= control target key start
LH: loop header
LB: loop body
LE: loop exit
PB: predicated region body
PF: predicated region fallthrough
CT: control target
= control target key end

     0   :  { %s1279_s26 = smov 0   ;;  %s1601_s0 = inlined_call_operand.vmem [shape: f32[256,64], index: 0, kind: input, shape index: {}]   ;;  %s1602_s1 = inlined_call_operand.vmem [shape: bf16[64,64], index: 1, kind: input, shape index: {}]   ;;  %s1603_s2 = inlined_call_operand.vmem [shape: f32[1,64], index: 2, kind: input, shape index: {}]   ;;  %s1604_s3 = inlined_call_operand.vmem [shape: bf16[64,64], index: 3, kind: input, shape index: {}]   ;;  %s1605_s4 = inlined_call_operand.vmem [shape: f32[1,64], index: 4, kind: input, shape index: {}]   ;;  %s1606_s5 = inlined_call_operand.vmem [shape: f32[1,64], index: 5, kind: input, shape index: {}]   ;;  %s1607_s6 = inlined_call_operand.<no memory space> [shape: f32[1,1], index: 6, kind: input, shape index: {}]   ;;  %s1608_s7 = inlined_call_operand.vmem [shape: f32[256,1], index: 7, kind: output, shape index: {}]  }
   0x1   :  { %12 = sst [smem:[#allocation2]] %s1607_s6 }
   0x2 LB: > { %s1062_s27 = sadd.s32 4294967295, %s1234_s26   ;;  %p1066_p0 = scmp.ge.s32.totalorder %s1234_s26, 1  ;;  %s1234_s26 = sphi %s1279_s26, %s18_s26  }
   0x3   : > { %p239_p1 = scmp.lt.s32.totalorder %s1234_s26, 3 }
   0x5   : > { %p240_p2 = pnand %p1066_p0, %p239_p1 }
   0x6   : > { %s1067_s6 = sshll.u32 (!%p240_p2), %s1062_s27, 4  ;;  %s667_s10 = sld [smem:[#allocation2]] (!%p240_p2) }
   0x7   : > { %243 = sbr.rel (%p240_p2) target bundleno = 520 (0x208), region = 48  ;;  %p272_p3 = scmp.lt.s32.totalorder (!%p240_p2), %s1067_s6, 31 }
   0xc   : > { %v1140_v0 = vld [vmem:[%s1602_s1 + $0x18] sm:$0xff]  ;;  %v1139_v1 = vld [vmem:[%s1602_s1 + $0x10] sm:$0xff]  ;;  %s1618_s6 = smov (!%p272_p3, %s1067_s6), 31  ;;  %v1138_v2 = vld [vmem:[%s1602_s1 + $0x8] sm:$0xff]  ;;  %vm344_vm0 = vcmask 523264   ;;  %vm989_vm3 = vcmask 7168  }
   0xd   : > { %373 = vmatpush.bf16.msra.mxu0 %v1140_v0  ;;  %1145 = vmatpush.bf16.msra.mxu2 %v1140_v0  ;;  %s1068_s9 = sshll.u32 %s1618_s6, 3  ;;  %v1137_v3 = vld [vmem:[%s1602_s1] sm:$0xff]  ;;  %v1144_v28 = vld [vmem:[%s1604_s3 + $0x18] sm:$0xff]  ;;  %v1143_v29 = vld [vmem:[%s1604_s3 + $0x10] sm:$0xff] }
   0xe   : > { %s1304_s14 = scalar_lea.vmem %s1601_s0, %s1068_s9  ;;  %522 = vmatpush.bf16.msra.mxu1 %v1144_v28  ;;  %1149 = vmatpush.bf16.msra.mxu3 %v1144_v28  ;;  %v1142_v30 = vld [vmem:[%s1604_s3 + $0x8] sm:$0xff]  ;;  %v1141_v31 = vld [vmem:[%s1604_s3] sm:$0xff]  ;;  %s1448_s13 = scalar_lea.vmem %s1608_s7, %s1068_s9 }
   0xf   : > { %v284_v4 = vld [vmem:[%s1304_s14] sm:$0xff]  ;;  %v285_v5 = vld [vmem:[%s1304_s14 + $0x8] sm:$0xff]  ;;  %v286_v10 = vld [vmem:[%s1304_s14 + $0x10] sm:$0xff] }
  0x10   : > { %v292_v6 = vld [vmem:[%s1304_s14 + $0x40] sm:$0xff]  ;;  %v293_v7 = vld [vmem:[%s1304_s14 + $0x48] sm:$0xff]  ;;  %v300_v8 = vpack.c.bf16 %v285_v5, %v284_v4  ;;  %v287_v11 = vld [vmem:[%s1304_s14 + $0x18] sm:$0xff] }
  0x11   : > { %374 = vmatpush.bf16.msra.mxu0 %v1139_v1  ;;  %1146 = vmatpush.bf16.msra.mxu2 %v1139_v1  ;;  %v304_v9 = vpack.c.bf16 %v293_v7, %v292_v6  ;;  %v294_v12 = vld [vmem:[%s1304_s14 + $0x50] sm:$0xff]  ;;  %v295_v13 = vld [vmem:[%s1304_s14 + $0x58] sm:$0xff]  ;;  %v301_v14 = vpack.c.bf16 %v287_v11, %v286_v10  ;;  %v288_v16 = vld [vmem:[%s1304_s14 + $0x20] sm:$0xff] }
  0x12   : > { %v305_v15 = vpack.c.bf16 %v295_v13, %v294_v12  ;;  %v289_v17 = vld [vmem:[%s1304_s14 + $0x28] sm:$0xff]  ;;  %v296_v18 = vld [vmem:[%s1304_s14 + $0x60] sm:$0xff]  ;;  %v290_v22 = vld [vmem:[%s1304_s14 + $0x30] sm:$0xff]  ;;  %523 = vmatpush.bf16.msra.mxu1 %v1143_v29  ;;  %1150 = vmatpush.bf16.msra.mxu3 %v1143_v29 }
  0x13   : > { %v297_v19 = vld [vmem:[%s1304_s14 + $0x68] sm:$0xff]  ;;  %v302_v20 = vpack.c.bf16 %v289_v17, %v288_v16  ;;  %v291_v23 = vld [vmem:[%s1304_s14 + $0x38] sm:$0xff]  ;;  %v298_v24 = vld [vmem:[%s1304_s14 + $0x70] sm:$0xff] }
  0x14   : > { %v306_v21 = vpack.c.bf16 %v297_v19, %v296_v18  ;;  %v299_v25 = vld [vmem:[%s1304_s14 + $0x78] sm:$0xff]  ;;  %v303_v26 = vpack.c.bf16 %v291_v23, %v290_v22  ;;  %v1348_v33 = vld [vmem:[%s1603_s2] ss:$0 sm:$0xff] }
  0x15   : > { %375 = vmatpush.bf16.msra.mxu0 %v1138_v2  ;;  %1147 = vmatpush.bf16.msra.mxu2 %v1138_v2  ;;  %v307_v27 = vpack.c.bf16 %v299_v25, %v298_v24 }
  0x16   : > { %524 = vmatpush.bf16.msra.mxu1 %v1142_v30  ;;  %1151 = vmatpush.bf16.msra.mxu3 %v1142_v30 }
  0x19   : > { %376 = vmatpush.bf16.msra.mxu0 %v1137_v3  ;;  %1148 = vmatpush.bf16.msra.mxu2 %v1137_v3 }
  0x1a   : > { %525 = vmatpush.bf16.msra.mxu1 %v1141_v31  ;;  %1152 = vmatpush.bf16.msra.mxu3 %v1141_v31 }
  0x1c   : > { %1087 = vmatmul.msk.bf16.vlgmr.msra.gmra.mxu0 %vm344_vm0, %v300_v8  ;;  %1091 = vmatmul.msk.bf16.vlgmr.msra.gmra.mxu2 %vm344_vm0, %v304_v9 }
  0x2c   : > { %1088 = vmatmul.msk.bf16.gmra.mxu0 %vm344_vm0, %v301_v14  ;;  %1092 = vmatmul.msk.bf16.gmra.mxu2 %vm344_vm0, %v305_v15 }
  0x3c   : > { %1089 = vmatmul.msk.bf16.gmra.mxu0 %vm344_vm0, %v302_v20  ;;  %1093 = vmatmul.msk.bf16.gmra.mxu2 %vm344_vm0, %v306_v21 }
  0x4c   : > { %1090 = vmatmul.msk.bf16.gmra.mxu0 %vm344_vm0, %v303_v26  ;;  %1094 = vmatmul.msk.bf16.gmra.mxu2 %vm344_vm0, %v307_v27 }
  0x99   : > { %v378_v32 = vpop.f32.mrf.mxu0 }
  0x9a   : > { %v379_v34 = vadd.f32 %v1348_v33, %v378_v32 }
  0x9c   : > { %v418_v37 = vmul.f32 0.2, %v379_v34 }
  0x9e   : > { %v434_v41 = vmax.f32 %v379_v34, %v418_v37 }
  0x9f   : > { %v398_v35 = vpop.f32.mrf.mxu2 }
  0xa0   : > { %v399_v39 = vadd.f32 %v1348_v33, %v398_v35 }
  0xa1   : > { %v380_v36 = vpop.f32.mrf.mxu0 }
  0xa2   : > { %v381_v38 = vadd.f32 %v1348_v33, %v380_v36  ;;  %v426_v44 = vmul.f32 0.2, %v399_v39 }
  0xa4   : > { %v419_v40 = vmul.f32 0.2, %v381_v38  ;;  %v442_v49 = vmax.f32 %v399_v39, %v426_v44 }
  0xa6   : > { %v435_v42 = vmax.f32 %v381_v38, %v419_v40 }
  0xa7   : > { %v400_v43 = vpop.f32.mrf.mxu2 }
  0xa8   : > { %v401_v45 = vadd.f32 %v1348_v33, %v400_v43  ;;  %v450_v46 = vpack.c.bf16 %v435_v42, %v434_v41  ;;  %v1377_v42 = vld [vmem:[%s1605_s4] ss:$0 sm:$0xff] }
  0xa9   : > { %v383_v47 = vpop.f32.mrf.mxu0 }
  0xaa   : > { %v427_v48 = vmul.f32 0.2, %v401_v45  ;;  %1111 = vmatmul.msk.bf16.vlgmr.msra.gmra.mxu1 %vm344_vm0, %v450_v46  ;;  %v384_v51 = vadd.f32 %v1348_v33, %v383_v47 }
  0xac   : > { %v443_v50 = vmax.f32 %v401_v45, %v427_v48  ;;  %v420_v55 = vmul.f32 0.2, %v384_v51 }
  0xae   : > { %v454_v52 = vpack.c.bf16 %v443_v50, %v442_v49  ;;  %v436_v59 = vmax.f32 %v384_v51, %v420_v55 }
  0xaf   : > { %v403_v53 = vpop.f32.mrf.mxu2 }
  0xb0   : > { %1115 = vmatmul.msk.bf16.vlgmr.msra.gmra.mxu3 %vm344_vm0, %v454_v52  ;;  %v404_v57 = vadd.f32 %v1348_v33, %v403_v53 }
  0xb1   : > { %v385_v54 = vpop.f32.mrf.mxu0 }
  0xb2   : > { %v386_v56 = vadd.f32 %v1348_v33, %v385_v54  ;;  %v428_v62 = vmul.f32 0.2, %v404_v57 }
  0xb4   : > { %v421_v58 = vmul.f32 0.2, %v386_v56  ;;  %v444_v3 = vmax.f32 %v404_v57, %v428_v62 }
  0xb6   : > { %v437_v60 = vmax.f32 %v386_v56, %v421_v58 }
  0xb7   : > { %v405_v61 = vpop.f32.mrf.mxu2 }
  0xb8   : > { %v406_v63 = vadd.f32 %v1348_v33, %v405_v61  ;;  %v451_v0 = vpack.c.bf16 %v437_v60, %v436_v59 }
  0xb9   : > { %v388_v1 = vpop.f32.mrf.mxu0 }
  0xba   : > { %v429_v2 = vmul.f32 0.2, %v406_v63  ;;  %1112 = vmatmul.msk.bf16.gmra.mxu1 %vm344_vm0, %v451_v0  ;;  %v389_v5 = vadd.f32 %v1348_v33, %v388_v1 }
  0xbc   : > { %v445_v4 = vmax.f32 %v406_v63, %v429_v2  ;;  %v422_v9 = vmul.f32 0.2, %v389_v5 }
  0xbe   : > { %v455_v6 = vpack.c.bf16 %v445_v4, %v444_v3  ;;  %v438_v13 = vmax.f32 %v389_v5, %v422_v9 }
  0xbf   : > { %v408_v7 = vpop.f32.mrf.mxu2 }
  0xc0   : > { %1116 = vmatmul.msk.bf16.gmra.mxu3 %vm344_vm0, %v455_v6  ;;  %v409_v11 = vadd.f32 %v1348_v33, %v408_v7 }
  0xc1   : > { %v390_v8 = vpop.f32.mrf.mxu0 }
  0xc2   : > { %v391_v10 = vadd.f32 %v1348_v33, %v390_v8  ;;  %v430_v16 = vmul.f32 0.2, %v409_v11 }
  0xc4   : > { %v423_v12 = vmul.f32 0.2, %v391_v10  ;;  %v446_v21 = vmax.f32 %v409_v11, %v430_v16 }
  0xc6   : > { %v439_v14 = vmax.f32 %v391_v10, %v423_v12 }
  0xc7   : > { %v410_v15 = vpop.f32.mrf.mxu2 }
  0xc8   : > { %v411_v17 = vadd.f32 %v1348_v33, %v410_v15  ;;  %v452_v18 = vpack.c.bf16 %v439_v14, %v438_v13 }
  0xc9   : > { %v393_v19 = vpop.f32.mrf.mxu0 }
  0xca   : > { %v431_v20 = vmul.f32 0.2, %v411_v17  ;;  %1113 = vmatmul.msk.bf16.gmra.mxu1 %vm344_vm0, %v452_v18  ;;  %v394_v23 = vadd.f32 %v1348_v33, %v393_v19 }
  0xcc   : > { %v447_v22 = vmax.f32 %v411_v17, %v431_v20  ;;  %v424_v27 = vmul.f32 0.2, %v394_v23 }
  0xce   : > { %v456_v24 = vpack.c.bf16 %v447_v22, %v446_v21  ;;  %v440_v31 = vmax.f32 %v394_v23, %v424_v27 }
  0xcf   : > { %v413_v25 = vpop.f32.mrf.mxu2 }
  0xd0   : > { %1117 = vmatmul.msk.bf16.gmra.mxu3 %vm344_vm0, %v456_v24  ;;  %v414_v29 = vadd.f32 %v1348_v33, %v413_v25 }
  0xd1   : > { %v395_v26 = vpop.f32.mrf.mxu0 }
  0xd2   : > { %v396_v28 = vadd.f32 %v1348_v33, %v395_v26  ;;  %v432_v35 = vmul.f32 0.2, %v414_v29 }
  0xd4   : > { %v425_v30 = vmul.f32 0.2, %v396_v28  ;;  %v448_v39 = vmax.f32 %v414_v29, %v432_v35 }
  0xd6   : > { %v441_v32 = vmax.f32 %v396_v28, %v425_v30 }
  0xd7   : > { %v415_v34 = vpop.f32.mrf.mxu2 }
  0xd8   : > { %v416_v36 = vadd.f32 %v1348_v33, %v415_v34  ;;  %v453_v37 = vpack.c.bf16 %v441_v32, %v440_v31  ;;  %v1383_v33 = vld [vmem:[%s1606_s5] ss:$0 sm:$0xff] }
  0xda   : > { %v433_v38 = vmul.f32 0.2, %v416_v36  ;;  %1114 = vmatmul.msk.bf16.gmra.mxu1 %vm344_vm0, %v453_v37 }
  0xdc   : > { %v449_v40 = vmax.f32 %v416_v36, %v433_v38 }
  0xde   : > { %v457_v41 = vpack.c.bf16 %v449_v40, %v448_v39 }
  0xe0   : > { %1118 = vmatmul.msk.bf16.gmra.mxu3 %vm344_vm0, %v457_v41 }
 0x127   : > { %v527_v43 = vpop.f32.mrf.mxu1 }
 0x128   : > { %v528_v44 = vadd.f32 %v1377_v42, %v527_v43 }
 0x12a   : > { %v567_v45 = vmul.f32 0.2, %v528_v44 }
 0x12c   : > { %v583_v46 = vmax.f32 %v528_v44, %v567_v45 }
 0x12e   : > { %v603_v47 = vmul.f32 %v1383_v33, %v583_v46 }
 0x12f   : > { %v529_v48 = vpop.f32.mrf.mxu1 }
 0x130   : > { %v530_v49 = vadd.f32 %v1377_v42, %v529_v48  ;;  %v619_v50 = vsel %vm344_vm0, %v603_v47, 0.0 }
 0x131   : > { %620 = vadd.xlane.f32.xlu0 %v619_v50 }
 0x132   : > { %v568_v51 = vmul.f32 0.2, %v530_v49 }
 0x133   : > { %v547_v52 = vpop.f32.mrf.mxu3 }
 0x134   : > { %v584_v53 = vmax.f32 %v530_v49, %v568_v51  ;;  %v548_v54 = vadd.f32 %v1377_v42, %v547_v52 }
 0x136   : > { %v575_v55 = vmul.f32 0.2, %v548_v54  ;;  %v604_v56 = vmul.f32 %v1383_v33, %v584_v53 }
 0x137   : > { %v532_v57 = vpop.f32.mrf.mxu1 }
 0x138   : > { %v591_v58 = vmax.f32 %v548_v54, %v575_v55  ;;  %v533_v59 = vadd.f32 %v1377_v42, %v532_v57  ;;  %v622_v60 = vsel %vm344_vm0, %v604_v56, 0.0 }
 0x139   : > { %623 = vadd.xlane.f32.xlu0 %v622_v60 }
 0x13a   : > { %v569_v61 = vmul.f32 0.2, %v533_v59  ;;  %v611_v62 = vmul.f32 %v1383_v33, %v591_v58 }
 0x13b   : > { %v549_v63 = vpop.f32.mrf.mxu3 }
 0x13c   : > { %v585_v0 = vmax.f32 %v533_v59, %v569_v61  ;;  %v550_v1 = vadd.f32 %v1377_v42, %v549_v63  ;;  %v643_v2 = vsel %vm344_vm0, %v611_v62, 0.0 }
 0x13d   : > { %644 = vadd.xlane.f32.xlu2 %v643_v2 }
 0x13e   : > { %v576_v3 = vmul.f32 0.2, %v550_v1  ;;  %v605_v4 = vmul.f32 %v1383_v33, %v585_v0 }
 0x13f   : > { %v534_v5 = vpop.f32.mrf.mxu1 }
 0x140   : > { %v592_v6 = vmax.f32 %v550_v1, %v576_v3  ;;  %v535_v7 = vadd.f32 %v1377_v42, %v534_v5  ;;  %v625_v8 = vsel %vm344_vm0, %v605_v4, 0.0 }
 0x141   : > { %626 = vadd.xlane.f32.xlu1 %v625_v8 }
 0x142   : > { %v570_v9 = vmul.f32 0.2, %v535_v7  ;;  %v612_v10 = vmul.f32 %v1383_v33, %v592_v6 }
 0x143   : > { %v552_v11 = vpop.f32.mrf.mxu3 }
 0x144   : > { %v586_v12 = vmax.f32 %v535_v7, %v570_v9  ;;  %v553_v13 = vadd.f32 %v1377_v42, %v552_v11  ;;  %v646_v14 = vsel %vm344_vm0, %v612_v10, 0.0 }
 0x145   : > { %647 = vadd.xlane.f32.xlu0 %v646_v14 }
 0x146   : > { %v577_v15 = vmul.f32 0.2, %v553_v13  ;;  %v606_v16 = vmul.f32 %v1383_v33, %v586_v12 }
 0x147   : > { %v537_v17 = vpop.f32.mrf.mxu1 }
 0x148   : > { %v593_v18 = vmax.f32 %v553_v13, %v577_v15  ;;  %v538_v19 = vadd.f32 %v1377_v42, %v537_v17  ;;  %v628_v20 = vsel %vm344_vm0, %v606_v16, 0.0  ;;  %v1432_v13 = vstv %s667_s10 }
 0x149   : > { %629 = vadd.xlane.f32.xlu1 %v628_v20 }
 0x14a   : > { %v571_v21 = vmul.f32 0.2, %v538_v19  ;;  %v613_v25 = vmul.f32 %v1383_v33, %v593_v18 }
 0x14b   : > { %v554_v22 = vpop.f32.mrf.mxu3 }
 0x14c   : > { %v587_v23 = vmax.f32 %v538_v19, %v571_v21  ;;  %v555_v24 = vadd.f32 %v1377_v42, %v554_v22  ;;  %v649_v32 = vsel %vm344_vm0, %v613_v25, 0.0 }
 0x14e   : > { %v578_v26 = vmul.f32 0.2, %v555_v24  ;;  %v607_v27 = vmul.f32 %v1383_v33, %v587_v23 }
 0x14f   : > { %v539_v28 = vpop.f32.mrf.mxu1 }
 0x150   : > { %v594_v29 = vmax.f32 %v555_v24, %v578_v26  ;;  %v540_v30 = vadd.f32 %v1377_v42, %v539_v28  ;;  %v631_v31 = vsel %vm344_vm0, %v607_v27, 0.0 }
 0x151   : > { %632 = vadd.xlane.f32.xlu2 %v631_v31  ;;  %650 = vadd.xlane.f32.xlu1 %v649_v32 }
 0x152   : > { %v572_v35 = vmul.f32 0.2, %v540_v30  ;;  %v614_v37 = vmul.f32 %v1383_v33, %v594_v29 }
 0x153   : > { %v557_v34 = vpop.f32.mrf.mxu3 }
 0x154   : > { %v558_v36 = vadd.f32 %v1377_v42, %v557_v34  ;;  %v588_v40 = vmax.f32 %v540_v30, %v572_v35  ;;  %v652_v44 = vsel %vm344_vm0, %v614_v37, 0.0 }
 0x156   : > { %v579_v38 = vmul.f32 0.2, %v558_v36  ;;  %v608_v50 = vmul.f32 %v1383_v33, %v588_v40 }
 0x157   : > { %v542_v39 = vpop.f32.mrf.mxu1 }
 0x158   : > { %v595_v41 = vmax.f32 %v558_v36, %v579_v38  ;;  %v543_v43 = vadd.f32 %v1377_v42, %v542_v39  ;;  %v634_v54 = vsel %vm344_vm0, %v608_v50, 0.0 }
 0x159   : > { %653 = vadd.xlane.f32.xlu2 %v652_v44 }
 0x15a   : > { %v573_v45 = vmul.f32 0.2, %v543_v43  ;;  %v615_v46 = vmul.f32 %v1383_v33, %v595_v41 }
 0x15b   : > { %v559_v47 = vpop.f32.mrf.mxu3 }
 0x15c   : > { %v589_v48 = vmax.f32 %v543_v43, %v573_v45  ;;  %v655_v49 = vsel %vm344_vm0, %v615_v46, 0.0  ;;  %v560_v52 = vadd.f32 %v1377_v42, %v559_v47 }
 0x15d   : > { %656 = vadd.xlane.f32.xlu0 %v655_v49 }
 0x15e   : > { %v609_v55 = vmul.f32 %v1383_v33, %v589_v48  ;;  %v580_v58 = vmul.f32 0.2, %v560_v52 }
 0x15f   : > { %v544_v51 = vpop.f32.mrf.mxu1 }
 0x160   : > { %v545_v53 = vadd.f32 %v1377_v42, %v544_v51  ;;  %v637_v61 = vsel %vm344_vm0, %v609_v55, 0.0  ;;  %v596_v0 = vmax.f32 %v560_v52, %v580_v58 }
 0x161   : > { %635 = vadd.xlane.f32.xlu2 %v634_v54 }
 0x162   : > { %v574_v56 = vmul.f32 0.2, %v545_v53  ;;  %v616_v7 = vmul.f32 %v1383_v33, %v596_v0 }
 0x163   : > { %v562_v57 = vpop.f32.mrf.mxu3 }
 0x164   : > { %v590_v59 = vmax.f32 %v545_v53, %v574_v56  ;;  %v563_v60 = vadd.f32 %v1377_v42, %v562_v57  ;;  %v658_v10 = vsel %vm344_vm0, %v616_v7, 0.0 }
 0x165   : > { %638 = vadd.xlane.f32.xlu0 %v637_v61 }
 0x166   : > { %v581_v62 = vmul.f32 0.2, %v563_v60  ;;  %v610_v63 = vmul.f32 %v1383_v33, %v590_v59 }
 0x168   : > { %v597_v1 = vmax.f32 %v563_v60, %v581_v62  ;;  %v640_v2 = vsel %vm344_vm0, %v610_v63, 0.0 }
 0x169   : > { %641 = vadd.xlane.f32.xlu1 %v640_v2 }
 0x16a   : > { %v617_v3 = vmul.f32 %v1383_v33, %v597_v1 }
 0x16b   : > { %v564_v4 = vpop.f32.mrf.mxu3 }
 0x16c   : > { %v565_v5 = vadd.f32 %v1377_v42, %v564_v4  ;;  %v661_v6 = vsel %vm344_vm0, %v617_v3, 0.0 }
 0x16d   : > { %662 = vadd.xlane.f32.xlu2 %v661_v6 }
 0x16e   : > { %v582_v8 = vmul.f32 0.2, %v565_v5 }
 0x170   : > { %v598_v9 = vmax.f32 %v565_v5, %v582_v8 }
 0x171   : > { %659 = vadd.xlane.f32.xlu1 %v658_v10 }
 0x172   : > { %v618_v11 = vmul.f32 %v1383_v33, %v598_v9 }
 0x174   : > { %v664_v12 = vsel %vm344_vm0, %v618_v11, 0.0 }
 0x175   : > { %665 = vadd.xlane.f32.xlu0 %v664_v12 }
 0x1a4   : > { %v621_v14 = vpop.xlane.xlu0 %620 }
 0x1a5   : > { %v669_v42 = vadd.f32 %v1432_v13, %v621_v14 }
 0x1a7   : > { %v1119_v15 = vmul.f32 -1.442695, %v669_v42 }
 0x1a9   : > { %1164 = vpow2.f32 %v1119_v15 }
 0x1ac   : > { %v624_v16 = vpop.xlane.xlu0 %623 }
 0x1ad   : > { %v670_v17 = vadd.f32 %v1432_v13, %v624_v16 }
 0x1af   : > { %v1165_v18 = vpop.eup %1164  ;;  %v1120_v19 = vmul.f32 -1.442695, %v670_v17 }
 0x1b0   : > { %v733_v20 = vadd.f32 1.0, %v1165_v18  ;;  %v645_v21 = vpop.xlane.xlu2 %644 }
 0x1b1   : > { %1166 = vpow2.f32 %v1120_v19  ;;  %v677_v33 = vadd.f32 %v1432_v13, %v645_v21 }
 0x1b2   : > { %1168 = vrcp.f32 %v733_v20  ;;  %v758_v36 = vand.u32 2147483647, %v733_v20  ;;  %v760_v37 = vand.u32 2147483648, %v733_v20  ;;  %vm754_vm2 = vweird.f32 %v733_v20 }
 0x1b3   : > { %v1127_v22 = vmul.f32 -1.442695, %v677_v33 }
 0x1b4   : > { %v627_v23 = vpop.xlane.xlu1 %626  ;;  %v761_v47 = vor.u32 1.1754944e-38, %v760_v37  ;;  %vm759_vm5 = vcmp.eq.f32.partialorder %v758_v36, 8.507059e+37 }
 0x1b5   : > { %1170 = vpow2.f32 %v1127_v22  ;;  %v671_v24 = vadd.f32 %v1432_v13, %v627_v23 }
 0x1b7   : > { %v1167_v25 = vpop.eup %1166  ;;  %v1121_v26 = vmul.f32 -1.442695, %v671_v24 }
 0x1b8   : > { %v1169_v27 = vpop.eup %1168  ;;  %v734_v28 = vadd.f32 1.0, %v1167_v25  ;;  %v648_v29 = vpop.xlane.xlu0 %647 }
 0x1b9   : > { %v750_v30 = vmul.f32 %v1169_v27, %v733_v20  ;;  %1172 = vpow2.f32 %v1121_v26  ;;  %v678_v31 = vadd.f32 %v1432_v13, %v648_v29  ;;  %vm755_vm1 = vweird.f32 %v1169_v27 }
 0x1ba   : > { %1174 = vrcp.f32 %v734_v28  ;;  %vm756_vm4 = vmor %vm754_vm2, %vm755_vm1  ;;  %v773_v52 = vand.u32 2147483647, %v734_v28  ;;  %v775_v56 = vand.u32 2147483648, %v734_v28  ;;  %vm769_vm7 = vweird.f32 %v734_v28 }
 0x1bb   : > { %v1171_v32 = vpop.eup %1170  ;;  %v751_v34 = vsub.f32 1.0, %v750_v30  ;;  %v1128_v35 = vmul.f32 -1.442695, %v678_v31 }
 0x1bc   : > { %v1439_v38 = vadd.f32 1.0, %v1171_v32  ;;  %v630_v39 = vpop.xlane.xlu1 %629  ;;  %vm1458_vm8 = vcmp.eq.f32.partialorder %v773_v52, 8.507059e+37  ;;  %v776_v5 = vor.u32 1.1754944e-38, %v775_v56 }
 0x1bd   : > { %v752_v40 = vmul.f32 %v1169_v27, %v751_v34  ;;  %1176 = vpow2.f32 %v1128_v35  ;;  %v672_v41 = vadd.f32 %v1432_v13, %v630_v39 }
 0x1be   : > { %1178 = vrcp.f32 %v1439_v38  ;;  %v878_v2 = vand.u32 2147483647, %v1439_v38  ;;  %v880_v6 = vand.u32 2147483648, %v1439_v38  ;;  %vm874_vm11 = vweird.f32 %v1439_v38 }
 0x1bf   : > { %v1173_v43 = vpop.eup %1172  ;;  %v753_v44 = vadd.f32 %v1169_v27, %v752_v40  ;;  %v1122_v45 = vmul.f32 -1.442695, %v672_v41 }
 0x1c0   : > { %v1175_v46 = vpop.eup %1174  ;;  %v1450_v48 = vadd.f32 1.0, %v1173_v43  ;;  %vm879_vm12 = vcmp.eq.f32.partialorder %v878_v2, 8.507059e+37  ;;  %v881_v17 = vor.u32 1.1754944e-38, %v880_v6 }
 0x1c1   : > { %v757_v49 = vsel %vm756_vm4, %v1169_v27, %v753_v44  ;;  %v765_v50 = vmul.f32 %v1175_v46, %v734_v28  ;;  %1180 = vpow2.f32 %v1122_v45  ;;  %vm770_vm6 = vweird.f32 %v1175_v46 }
 0x1c2   : > { %v762_v51 = vsel %vm759_vm5, %v761_v47, %v757_v49  ;;  %1182 = vrcp.f32 %v1450_v48  ;;  %vm771_vm9 = vmor %vm769_vm7, %vm770_vm6  ;;  %v788_v18 = vand.u32 2147483647, %v1450_v48  ;;  %v790_v19 = vand.u32 2147483648, %v1450_v48 }
 0x1c3   : > { %v1177_v53 = vpop.eup %1176  ;;  %990 = vst.msk [vmem:[%s1448_s13] sm:$0xff] %vm989_vm3, %v762_v51  ;;  %v766_v54 = vsub.f32 1.0, %v765_v50  ;;  %vm784_vm15 = vweird.f32 %v1450_v48 }
 0x1c4   : > { %v1179_v55 = vpop.eup %1178  ;;  %v1455_v57 = vadd.f32 1.0, %v1177_v53  ;;  %v633_v58 = vpop.xlane.xlu2 %632  ;;  %vm789_vm1 = vcmp.eq.f32.partialorder %v788_v18, 8.507059e+37  ;;  %v791_v30 = vor.u32 1.1754944e-38, %v790_v19 }
 0x1c5   : > { %v767_v59 = vmul.f32 %v1175_v46, %v766_v54  ;;  %v870_v60 = vmul.f32 %v1179_v55, %v1439_v38  ;;  %v651_v61 = vpop.xlane.xlu1 %650  ;;  %v673_v3 = vadd.f32 %v1432_v13, %v633_v58  ;;  %vm875_vm10 = vweird.f32 %v1179_v55 }
 0x1c6   : > { %1184 = vrcp.f32 %v1455_v57  ;;  %v679_v8 = vadd.f32 %v1432_v13, %v651_v61  ;;  %vm876_vm13 = vmor %vm874_vm11, %vm875_vm10  ;;  %v893_v28 = vand.u32 2147483647, %v1455_v57  ;;  %v895_v31 = vand.u32 2147483648, %v1455_v57 }
 0x1c7   : > { %v1181_v63 = vpop.eup %1180  ;;  %v768_v0 = vadd.f32 %v1175_v46, %v767_v59  ;;  %v871_v1 = vsub.f32 1.0, %v870_v60  ;;  %v1123_v15 = vmul.f32 -1.442695, %v673_v3  ;;  %vm889_vm4 = vweird.f32 %v1455_v57 }
 0x1c8   : > { %v1183_v4 = vpop.eup %1182  ;;  %v1466_v7 = vadd.f32 1.0, %v1181_v63  ;;  %v1129_v20 = vmul.f32 -1.442695, %v679_v8  ;;  %vm894_vm5 = vcmp.eq.f32.partialorder %v893_v28, 8.507059e+37  ;;  %v896_v44 = vor.u32 1.1754944e-38, %v895_v31 }
 0x1c9   : > { %v772_v9 = vsel %vm771_vm9, %v1175_v46, %v768_v0  ;;  %v872_v10 = vmul.f32 %v1179_v55, %v871_v1  ;;  %v780_v11 = vmul.f32 %v1183_v4, %v1450_v48  ;;  %vm785_vm14 = vweird.f32 %v1183_v4 }
 0x1ca   : > { %v777_v12 = vsel %vm1458_vm8, %v776_v5, %v772_v9  ;;  %1186 = vrcp.f32 %v1466_v7  ;;  %vm786_vm0 = vmor %vm784_vm15, %vm785_vm14  ;;  %v803_v45 = vand.u32 2147483647, %v1466_v7  ;;  %v805_v46 = vand.u32 2147483648, %v1466_v7 }
 0x1cb   : > { %991 = vst.msk [vmem:[%s1448_s13 + $0x8] sm:$0xff] %vm989_vm3, %v777_v12  ;;  %v873_v14 = vadd.f32 %v1179_v55, %v872_v10  ;;  %v781_v42 = vsub.f32 1.0, %v780_v11  ;;  %1188 = vpow2.f32 %v1123_v15  ;;  %vm799_vm8 = vweird.f32 %v1466_v7 }
 0x1cc   : > { %v1185_v16 = vpop.eup %1184  ;;  %v654_v21 = vpop.xlane.xlu2 %653  ;;  %1190 = vpow2.f32 %v1129_v20  ;;  %v806_v58 = vor.u32 1.1754944e-38, %v805_v46  ;;  %vm804_vm10 = vcmp.eq.f32.partialorder %v803_v45, 8.507059e+37 }
 0x1cd   : > { %v877_v33 = vsel %vm876_vm13, %v1179_v55, %v873_v14  ;;  %v782_v22 = vmul.f32 %v1183_v4, %v781_v42  ;;  %v885_v23 = vmul.f32 %v1185_v16, %v1455_v57  ;;  %v680_v25 = vadd.f32 %v1432_v13, %v654_v21 }
 0x1ce   : > { %v882_v24 = vsel %vm879_vm12, %v881_v17, %v877_v33  ;;  %vm890_vm2 = vweird.f32 %v1185_v16 }
 0x1cf   : > { %998 = vst.msk [vmem:[%s1448_s13 + $0x40] sm:$0xff] %vm989_vm3, %v882_v24  ;;  %v783_v26 = vadd.f32 %v1183_v4, %v782_v22  ;;  %v886_v27 = vsub.f32 1.0, %v885_v23  ;;  %v1130_v32 = vmul.f32 -1.442695, %v680_v25  ;;  %vm891_vm6 = vmor %vm889_vm4, %vm890_vm2 }
 0x1d0   : > { %v1187_v29 = vpop.eup %1186  ;;  %v657_v34 = vpop.xlane.xlu0 %656 }
 0x1d1   : > { %v787_v35 = vsel %vm786_vm0, %v1183_v4, %v783_v26  ;;  %v887_v36 = vmul.f32 %v1185_v16, %v886_v27  ;;  %v795_v37 = vmul.f32 %v1187_v29, %v1466_v7  ;;  %1192 = vpow2.f32 %v1130_v32  ;;  %v1189_v43 = vpop.eup %1188 }
 0x1d2   : > { %v792_v38 = vsel %vm789_vm1, %v791_v30, %v787_v35  ;;  %v681_v39 = vadd.f32 %v1432_v13, %v657_v34  ;;  %v1191_v49 = vpop.eup %1190  ;;  %vm800_vm7 = vweird.f32 %v1187_v29  ;;  %v1492_v52 = vadd.f32 1.0, %v1189_v43 }
 0x1d3   : > { %992 = vst.msk [vmem:[%s1448_s13 + $0x10] sm:$0xff] %vm989_vm3, %v792_v38  ;;  %v888_v40 = vadd.f32 %v1185_v16, %v887_v36  ;;  %v796_v41 = vsub.f32 1.0, %v795_v37  ;;  %v1494_v54 = vadd.f32 1.0, %v1191_v49  ;;  %vm801_vm9 = vmor %vm799_vm8, %vm800_vm7 }
 0x1d4   : > { %v1131_v47 = vmul.f32 -1.442695, %v681_v39  ;;  %v636_v48 = vpop.xlane.xlu2 %635  ;;  %v818_v0 = vand.u32 2147483647, %v1492_v52  ;;  %v820_v2 = vand.u32 2147483648, %v1492_v52  ;;  %vm814_vm11 = vweird.f32 %v1492_v52 }
 0x1d5   : > { %v892_v50 = vsel %vm891_vm6, %v1185_v16, %v888_v40  ;;  %v797_v51 = vmul.f32 %v1187_v29, %v796_v41  ;;  %v674_v55 = vadd.f32 %v1432_v13, %v636_v48  ;;  %vm904_vm12 = vweird.f32 %v1494_v54 }
 0x1d6   : > { %v897_v53 = vsel %vm894_vm5, %v896_v44, %v892_v50  ;;  %1194 = vpow2.f32 %v1131_v47  ;;  %vm1516_vm13 = vcmp.eq.f32.partialorder %v818_v0, 8.507059e+37  ;;  %v908_v14 = vand.u32 2147483647, %v1494_v54 }
 0x1d7   : > { %999 = vst.msk [vmem:[%s1448_s13 + $0x48] sm:$0xff] %vm989_vm3, %v897_v53  ;;  %v798_v56 = vadd.f32 %v1187_v29, %v797_v51  ;;  %1196 = vrcp.f32 %v1492_v52  ;;  %v1193_v57 = vpop.eup %1192  ;;  %v1124_v63 = vmul.f32 -1.442695, %v674_v55  ;;  %v821_v15 = vor.u32 1.1754944e-38, %v820_v2 }
 0x1d8   : > { %1198 = vrcp.f32 %v1494_v54  ;;  %v1502_v60 = vadd.f32 1.0, %v1193_v57  ;;  %v639_v61 = vpop.xlane.xlu0 %638  ;;  %v910_v16 = vand.u32 2147483648, %v1494_v54  ;;  %vm1530_vm0 = vcmp.eq.f32.partialorder %v908_v14, 8.507059e+37 }
 0x1d9   : > { %v802_v59 = vsel %vm801_vm9, %v1187_v29, %v798_v56  ;;  %v675_v3 = vadd.f32 %v1432_v13, %v639_v61 }
 0x1da   : > { %v807_v62 = vsel %vm804_vm10, %v806_v58, %v802_v59  ;;  %1200 = vrcp.f32 %v1502_v60  ;;  %v923_v20 = vand.u32 2147483647, %v1502_v60  ;;  %v925_v25 = vand.u32 2147483648, %v1502_v60 }
 0x1db   : > { %993 = vst.msk [vmem:[%s1448_s13 + $0x18] sm:$0xff] %vm989_vm3, %v807_v62  ;;  %1202 = vpow2.f32 %v1124_v63  ;;  %v1125_v10 = vmul.f32 -1.442695, %v675_v3  ;;  %v911_v30 = vor.u32 1.1754944e-38, %v910_v16  ;;  %vm919_vm2 = vweird.f32 %v1502_v60 }
 0x1dc   : > { %v1195_v1 = vpop.eup %1194  ;;  %v642_v4 = vpop.xlane.xlu1 %641  ;;  %vm1544_vm6 = vcmp.eq.f32.partialorder %v923_v20, 8.507059e+37  ;;  %v926_v45 = vor.u32 1.1754944e-38, %v925_v25 }
 0x1dd   : > { %v1197_v5 = vpop.eup %1196  ;;  %v1510_v6 = vadd.f32 1.0, %v1195_v1  ;;  %v676_v7 = vadd.f32 %v1432_v13, %v642_v4 }
 0x1de   : > { %v1199_v8 = vpop.eup %1198  ;;  %v810_v9 = vmul.f32 %v1197_v5, %v1492_v52  ;;  %vm815_vm14 = vweird.f32 %v1197_v5 }
 0x1df   : > { %v900_v12 = vmul.f32 %v1199_v8, %v1494_v54  ;;  %1204 = vrcp.f32 %v1510_v6  ;;  %v1126_v21 = vmul.f32 -1.442695, %v676_v7  ;;  %vm905_vm15 = vweird.f32 %v1199_v8  ;;  %vm816_vm1 = vmor %vm814_vm11, %vm815_vm14 }
 0x1e0   : > { %v811_v42 = vsub.f32 1.0, %v810_v9  ;;  %1206 = vpow2.f32 %v1125_v10  ;;  %v663_v17 = vpop.xlane.xlu2 %662  ;;  %v1201_v18 = vpop.eup %1200  ;;  %vm906_vm4 = vmor %vm904_vm12, %vm905_vm15  ;;  %v938_v52 = vand.u32 2147483647, %v1510_v6  ;;  %v940_v53 = vand.u32 2147483648, %v1510_v6 }
 0x1e1   : > { %v901_v19 = vsub.f32 1.0, %v900_v12  ;;  %v683_v33 = vadd.f32 %v1432_v13, %v663_v17  ;;  %v1203_v22 = vpop.eup %1202  ;;  %v915_v24 = vmul.f32 %v1201_v18, %v1502_v60  ;;  %1208 = vpow2.f32 %v1126_v21 }
 0x1e2   : > { %v812_v23 = vmul.f32 %v1197_v5, %v811_v42  ;;  %v1528_v27 = vadd.f32 1.0, %v1203_v22  ;;  %vm920_vm5 = vweird.f32 %v1201_v18  ;;  %vm934_vm9 = vweird.f32 %v1510_v6 }
 0x1e3   : > { %v902_v26 = vmul.f32 %v1199_v8, %v901_v19  ;;  %v916_v31 = vsub.f32 1.0, %v915_v24  ;;  %v1133_v35 = vmul.f32 -1.442695, %v683_v33  ;;  %vm921_vm7 = vmor %vm919_vm2, %vm920_vm5  ;;  %v941_v0 = vor.u32 1.1754944e-38, %v940_v53 }
 0x1e4   : > { %v813_v28 = vadd.f32 %v1197_v5, %v812_v23  ;;  %1210 = vrcp.f32 %v1528_v27  ;;  %v660_v40 = vpop.xlane.xlu1 %659  ;;  %vm939_vm11 = vcmp.eq.f32.partialorder %v938_v52, 8.507059e+37 }
 0x1e5   : > { %v1205_v32 = vpop.eup %1204  ;;  %v903_v34 = vadd.f32 %v1199_v8, %v902_v26  ;;  %v917_v38 = vmul.f32 %v1201_v18, %v916_v31  ;;  %1212 = vpow2.f32 %v1133_v35  ;;  %v682_v54 = vadd.f32 %v1432_v13, %v660_v40 }
 0x1e6   : > { %v1207_v36 = vpop.eup %1206  ;;  %v817_v37 = vsel %vm816_vm1, %v1197_v5, %v813_v28  ;;  %v930_v39 = vmul.f32 %v1205_v32, %v1510_v6  ;;  %vm935_vm8 = vweird.f32 %v1205_v32 }
 0x1e7   : > { %v822_v41 = vsel %vm1516_vm13, %v821_v15, %v817_v37  ;;  %v907_v43 = vsel %vm906_vm4, %v1199_v8, %v903_v34  ;;  %v918_v47 = vadd.f32 %v1201_v18, %v917_v38  ;;  %v1552_v49 = vadd.f32 1.0, %v1207_v36  ;;  %v1209_v51 = vpop.eup %1208  ;;  %vm936_vm10 = vmor %vm934_vm9, %vm935_vm8 }
 0x1e8   : > { %994 = vst.msk [vmem:[%s1448_s13 + $0x20] sm:$0xff] %vm989_vm3, %v822_v41  ;;  %v912_v46 = vsel %vm1530_vm0, %v911_v30, %v907_v43  ;;  %v931_v48 = vsub.f32 1.0, %v930_v39  ;;  %v666_v50 = vpop.xlane.xlu0 %665  ;;  %v1565_v59 = vadd.f32 1.0, %v1209_v51  ;;  %v1132_v63 = vmul.f32 -1.442695, %v682_v54 }
 0x1e9   : > { %1000 = vst.msk [vmem:[%s1448_s13 + $0x50] sm:$0xff] %vm989_vm3, %v912_v46  ;;  %v922_v55 = vsel %vm921_vm7, %v1201_v18, %v918_v47  ;;  %1214 = vrcp.f32 %v1552_v49  ;;  %v684_v60 = vadd.f32 %v1432_v13, %v666_v50  ;;  %v835_v13 = vand.u32 2147483648, %v1528_v27 }
 0x1ea   : > { %v932_v56 = vmul.f32 %v1205_v32, %v931_v48  ;;  %v1211_v57 = vpop.eup %1210  ;;  %v927_v58 = vsel %vm1544_vm6, %v926_v45, %v922_v55  ;;  %1216 = vrcp.f32 %v1565_v59  ;;  %v833_v8 = vand.u32 2147483647, %v1528_v27 }
 0x1eb   : > { %1001 = vst.msk [vmem:[%s1448_s13 + $0x58] sm:$0xff] %vm989_vm3, %v927_v58  ;;  %v825_v62 = vmul.f32 %v1211_v57, %v1528_v27  ;;  %v1213_v3 = vpop.eup %1212  ;;  %1218 = vpow2.f32 %v1132_v63  ;;  %v1134_v5 = vmul.f32 -1.442695, %v684_v60  ;;  %vm830_vm12 = vweird.f32 %v1211_v57 }
 0x1ec   : > { %v933_v61 = vadd.f32 %v1205_v32, %v932_v56  ;;  %v747_v9 = vadd.f32 1.0, %v1213_v3  ;;  %vm829_vm13 = vweird.f32 %v1528_v27  ;;  %v836_v14 = vor.u32 1.1754944e-38, %v835_v13 }
 0x1ed   : > { %v826_v2 = vsub.f32 1.0, %v825_v62  ;;  %1220 = vpow2.f32 %v1134_v5  ;;  %vm831_vm14 = vmor %vm829_vm13, %vm830_vm12  ;;  %v850_v15 = vand.u32 2147483648, %v1552_v49  ;;  %vm834_vm15 = vcmp.eq.f32.partialorder %v833_v8, 8.507059e+37 }
 0x1ee   : > { %v937_v1 = vsel %vm936_vm10, %v1205_v32, %v933_v61  ;;  %1222 = vrcp.f32 %v747_v9  ;;  %v848_v21 = vand.u32 2147483647, %v1552_v49  ;;  %vm844_vm1 = vweird.f32 %v1552_v49 }
 0x1ef   : > { %v942_v4 = vsel %vm939_vm11, %v941_v0, %v937_v1  ;;  %v1215_v7 = vpop.eup %1214  ;;  %v827_v6 = vmul.f32 %v1211_v57, %v826_v2  ;;  %v851_v25 = vor.u32 1.1754944e-38, %v850_v15  ;;  %v865_v26 = vand.u32 2147483648, %v1565_v59 }
 0x1f0   : > { %1002 = vst.msk [vmem:[%s1448_s13 + $0x60] sm:$0xff] %vm989_vm3, %v942_v4  ;;  %v840_v10 = vmul.f32 %v1215_v7, %v1552_v49  ;;  %v1217_v12 = vpop.eup %1216  ;;  %vm845_vm0 = vweird.f32 %v1215_v7  ;;  %v863_v29 = vand.u32 2147483647, %v1565_v59  ;;  %vm849_vm5 = vcmp.eq.f32.partialorder %v848_v21, 8.507059e+37 }
 0x1f1   : > { %v828_v11 = vadd.f32 %v1211_v57, %v827_v6  ;;  %v855_v17 = vmul.f32 %v1217_v12, %v1565_v59  ;;  %v1219_v18 = vpop.eup %1218  ;;  %vm846_vm2 = vmor %vm844_vm1, %vm845_vm0  ;;  %vm860_vm4 = vweird.f32 %v1217_v12  ;;  %vm859_vm6 = vweird.f32 %v1565_v59 }
 0x1f2   : > { %v841_v42 = vsub.f32 1.0, %v840_v10  ;;  %v746_v22 = vadd.f32 1.0, %v1219_v18  ;;  %vm861_vm7 = vmor %vm859_vm6, %vm860_vm4  ;;  %v866_v36 = vor.u32 1.1754944e-38, %v865_v26  ;;  %vm864_vm8 = vcmp.eq.f32.partialorder %v863_v29, 8.507059e+37 }
 0x1f3   : > { %v832_v16 = vsel %vm831_vm14, %v1211_v57, %v828_v11  ;;  %v856_v33 = vsub.f32 1.0, %v855_v17  ;;  %v1221_v23 = vpop.eup %1220  ;;  %v970_v39 = vand.u32 2147483648, %v747_v9  ;;  %v968_v43 = vand.u32 2147483647, %v747_v9 }
 0x1f4   : > { %v837_v19 = vsel %vm834_vm15, %v836_v14, %v832_v16  ;;  %v842_v20 = vmul.f32 %v1215_v7, %v841_v42  ;;  %v1223_v27 = vpop.eup %1222  ;;  %1224 = vrcp.f32 %v746_v22  ;;  %v748_v35 = vadd.f32 1.0, %v1221_v23 }
 0x1f5   : > { %995 = vst.msk [vmem:[%s1448_s13 + $0x28] sm:$0xff] %vm989_vm3, %v837_v19  ;;  %v857_v28 = vmul.f32 %v1217_v12, %v856_v33  ;;  %v960_v31 = vmul.f32 %v1223_v27, %v747_v9  ;;  %vm965_vm9 = vweird.f32 %v1223_v27  ;;  %vm964_vm10 = vweird.f32 %v747_v9 }
 0x1f6   : > { %v843_v24 = vadd.f32 %v1215_v7, %v842_v20  ;;  %1226 = vrcp.f32 %v748_v35  ;;  %vm966_vm11 = vmor %vm964_vm10, %vm965_vm9  ;;  %v971_v47 = vor.u32 1.1754944e-38, %v970_v39  ;;  %vm969_vm12 = vcmp.eq.f32.partialorder %v968_v43, 8.507059e+37 }
 0x1f7   : > { %v858_v34 = vadd.f32 %v1217_v12, %v857_v28  ;;  %v961_v37 = vsub.f32 1.0, %v960_v31  ;;  %v953_v52 = vand.u32 2147483647, %v746_v22  ;;  %v955_v53 = vand.u32 2147483648, %v746_v22 }
 0x1f8   : > { %v847_v30 = vsel %vm846_vm2, %v1215_v7, %v843_v24  ;;  %vm949_vm14 = vweird.f32 %v746_v22  ;;  %v985_v59 = vand.u32 2147483648, %v748_v35  ;;  %v983_v62 = vand.u32 2147483647, %v748_v35 }
 0x1f9   : > { %v852_v32 = vsel %vm849_vm5, %v851_v25, %v847_v30  ;;  %v862_v38 = vsel %vm861_vm7, %v1217_v12, %v858_v34  ;;  %v962_v41 = vmul.f32 %v1223_v27, %v961_v37  ;;  %vm954_vm0 = vcmp.eq.f32.partialorder %v953_v52, 8.507059e+37 }
 0x1fa   : > { %996 = vst.msk [vmem:[%s1448_s13 + $0x30] sm:$0xff] %vm989_vm3, %v852_v32  ;;  %v867_v40 = vsel %vm864_vm8, %v866_v36, %v862_v38  ;;  %v1225_v44 = vpop.eup %1224  ;;  %v956_v58 = vor.u32 1.1754944e-38, %v955_v53  ;;  %vm979_vm2 = vweird.f32 %v748_v35  ;;  %v986_v1 = vor.u32 1.1754944e-38, %v985_v59 }
 0x1fb   : > { %997 = vst.msk [vmem:[%s1448_s13 + $0x38] sm:$0xff] %vm989_vm3, %v867_v40  ;;  %v963_v45 = vadd.f32 %v1223_v27, %v962_v41  ;;  %v945_v46 = vmul.f32 %v1225_v44, %v746_v22  ;;  %vm950_vm13 = vweird.f32 %v1225_v44  ;;  %vm984_vm5 = vcmp.eq.f32.partialorder %v983_v62, 8.507059e+37 }
 0x1fc   : > { %v1227_v50 = vpop.eup %1226  ;;  %vm951_vm15 = vmor %vm949_vm14, %vm950_vm13 }
 0x1fd   : > { %v967_v48 = vsel %vm966_vm11, %v1223_v27, %v963_v45  ;;  %v946_v49 = vsub.f32 1.0, %v945_v46  ;;  %v975_v55 = vmul.f32 %v1227_v50, %v748_v35  ;;  %vm980_vm1 = vweird.f32 %v1227_v50 }
 0x1fe   : > { %v972_v51 = vsel %vm969_vm12, %v971_v47, %v967_v48  ;;  %vm981_vm4 = vmor %vm979_vm2, %vm980_vm1 }
 0x1ff   : > { %1004 = vst.msk [vmem:[%s1448_s13 + $0x70] sm:$0xff] %vm989_vm3, %v972_v51  ;;  %v947_v54 = vmul.f32 %v1225_v44, %v946_v49  ;;  %v976_v57 = vsub.f32 1.0, %v975_v55 }
 0x201   : > { %v948_v56 = vadd.f32 %v1225_v44, %v947_v54  ;;  %v977_v61 = vmul.f32 %v1227_v50, %v976_v57 }
 0x203   : > { %v952_v60 = vsel %vm951_vm15, %v1225_v44, %v948_v56  ;;  %v978_v0 = vadd.f32 %v1227_v50, %v977_v61 }
 0x204   : > { %v957_v63 = vsel %vm954_vm0, %v956_v58, %v952_v60 }
 0x205   : > { %1003 = vst.msk [vmem:[%s1448_s13 + $0x68] sm:$0xff] %vm989_vm3, %v957_v63  ;;  %v982_v2 = vsel %vm981_vm4, %v1227_v50, %v978_v0 }
 0x206   : > { %v987_v3 = vsel %vm984_vm5, %v986_v1, %v982_v2 }
 0x207   : > { %1005 = vst.msk [vmem:[%s1448_s13 + $0x78] sm:$0xff] %vm989_vm3, %v987_v3 }
 0x208 PF: > { %s18_s26 = sadd.s32 1, %s1234_s26  }
 0x209   : > { %p15_p4 = scmp.ge.s32.totalorder %s18_s26, 4  }
 0x20b   :  { %17 = sbr.rel (!%p15_p4) target bundleno = 2 (0x2), region = 78 }

</bundles_post_ra>
